<compile_context>
chip_gen: v6e
topology: v6e:2x2x1
jax: 0.10.0
libtpu: 0.0.40
codegen_flags: <defaults>
</compile_context>

<pallas_src>
import functools

import jax
import jax.numpy as jnp
from jax.experimental import pallas as pl
from jax.experimental.pallas import tpu as pltpu


def _round_up(x: int, m: int) -> int:
    return ((x + m - 1) // m) * m


def _popdecoder_kernel(x_ref, w_ref, b_ref, o_ref, *, apply_tanh: bool, precision):
    # x_ref: (TN, K_eff)  w_ref: (K_eff, A_out)  b_ref: (1, A_out)  o_ref: (TN, A_out)
    raw = jnp.dot(x_ref[...], w_ref[...],
                  preferred_element_type=jnp.float32,
                  precision=precision) + b_ref[...]
    if apply_tanh:
        raw = jnp.tanh(raw)
    o_ref[...] = raw.astype(o_ref.dtype)


def _block_diag_params(weight, bias, act_dim, pop_dim, fold):
    """W_bd[j*K + a*P + p, j*A + a'] = w[a,p]*(a==a');  b_bd[j*A + a] = b[a]."""
    w = jnp.asarray(weight, jnp.float32).reshape(act_dim, pop_dim)
    b = jnp.asarray(bias, jnp.float32).reshape(act_dim)
    k = act_dim * pop_dim
    sel = jnp.eye(act_dim, dtype=jnp.float32)                       # (A, A)
    w_bd = (w[:, :, None] * sel[:, None, :]).reshape(k, act_dim)    # (K, A)
    if fold > 1:
        eyef = jnp.eye(fold, dtype=jnp.float32)
        w_bd = (eyef[:, None, :, None] * w_bd[None, :, None, :]
                ).reshape(fold * k, fold * act_dim)
        b = jnp.tile(b, fold)
    return w_bd, b.reshape(1, fold * act_dim)


def make_pop_decoder(weight, bias, *, act_dim, pop_dim, decode="fr-mlp",
                     small_n_threshold=4096, matmul_precision=None):
    """Build a PopDecoder forward fn.  Returned callable:
        apply(pop_act, force_pallas=False) -> (N, act_dim) float32
    pop_act: anything reshapable to (N, act_dim*pop_dim), f32 or bf16.
    weight:  (act_dim, 1, pop_dim) PyTorch grouped-Conv1d weight (or (A, P)).
    bias:    (act_dim,)."""
    k = act_dim * pop_dim
    apply_tanh = "fr" in decode

    # Precompute block-diagonal params once (fold=1 and the max lane-dense fold).
    fold_max = max(1, 128 // k)
    params = {1: _block_diag_params(weight, bias, act_dim, pop_dim, 1)}
    if fold_max > 1:
        params[fold_max] = _block_diag_params(weight, bias, act_dim, pop_dim, fold_max)

    # Per-generation streaming-VMEM budget (guarded: never fails off-TPU).
    try:
        vmem_cap = pltpu.get_tpu_info().vmem_capacity_bytes
    except Exception:
        vmem_cap = 64 * 1024 * 1024
    big_vmem = vmem_cap >= 100 * 1024 * 1024            # v5e / v6e (128 MiB physical)
    stream_budget = (48 if big_vmem else 24) * 1024 * 1024
    vmem_limit = (64 if big_vmem else 32) * 1024 * 1024
    tn_abs_max = 16384 if big_vmem else 8192            # v7x: stay within 64 MiB

    kernel = functools.partial(_popdecoder_kernel,
                               apply_tanh=apply_tanh, precision=matmul_precision)
    w_f32 = jnp.asarray(weight, jnp.float32).reshape(act_dim, pop_dim)
    b_f32 = jnp.asarray(bias, jnp.float32).reshape(act_dim)

    def _xla_path(x):  # x: (N, K) — small-N fallback, avoids pallas launch overhead
        raw = jnp.einsum("nap,ap->na",
                         x.reshape(-1, act_dim, pop_dim).astype(jnp.float32),
                         w_f32) + b_f32[None, :]
        return jnp.tanh(raw) if apply_tanh else raw

    def apply(pop_act, *, force_pallas=False):
        x = pop_act.reshape(-1, k)
        if x.dtype != jnp.float32 and x.dtype != jnp.bfloat16:
            x = x.astype(jnp.float32)     # bf16 producers stay bf16 (no extra HBM pass)
        n = x.shape[0]

        if n < small_n_threshold and not force_pallas:
            return _xla_path(x)

        fold = fold_max if (fold_max > 1 and n % fold_max == 0) else 1
        w_bd, b_bd = params[fold]
        n_eff = n // fold
        k_eff = fold * k
        a_out = fold * act_dim
        x_eff = x.reshape(n_eff, k_eff)   # contiguous view, no data movement

        # Batch tile: fill the streaming budget (double-buffered x + out tiles,
        # lane-padded to 128 in VMEM), then force >=2 grid steps when possible
        # so both v7x TensorCores get work.
        row_bytes = (_round_up(k_eff, 128) * x_eff.dtype.itemsize
                     + _round_up(a_out, 128) * 4)
        tn_cap = min(tn_abs_max,
                     max(8, (stream_budget // (2 * row_bytes)) // 8 * 8))
        steps = max(2, pl.cdiv(n_eff, tn_cap))
        tn = min(_round_up(pl.cdiv(n_eff, steps), 8), _round_up(n_eff, 8))
        grid = (pl.cdiv(n_eff, tn),)

        out = pl.pallas_call(
            kernel,
            out_shape=jax.ShapeDtypeStruct((n_eff, a_out), jnp.float32),
            grid_spec=pltpu.PrefetchScalarGridSpec(
                num_scalar_prefetch=0,
                grid=grid,
                in_specs=[
                    pl.BlockSpec((tn, k_eff), lambda i: (i, 0)),     # streamed batch
                    pl.BlockSpec((k_eff, a_out), lambda i: (0, 0)),  # resident weight
                    pl.BlockSpec((1, a_out), lambda i: (0, 0)),      # resident bias
                ],
                # Narrow, unpadded output: last block dim == full array dim.
                out_specs=pl.BlockSpec((tn, a_out), lambda i: (i, 0)),
            ),
            compiler_params=pltpu.CompilerParams(
                dimension_semantics=("parallel",),   # shard batch across TCs (v7x)
                vmem_limit_bytes=vmem_limit,
            ),
        )(x_eff, w_bd, b_bd)

        return out.reshape(n, act_dim)    # free contiguous view (un-fold)

    return apply


def _reference(pop_act, weight, bias, *, act_dim, pop_dim, decode):
    x = jnp.asarray(pop_act, jnp.float32).reshape(-1, act_dim, pop_dim)
    w = jnp.asarray(weight, jnp.float32).reshape(act_dim, pop_dim)
    raw = jnp.sum(x * w[None], axis=-1) + jnp.asarray(bias, jnp.float32)[None, :]
    return jnp.tanh(raw) if "fr" in decode else raw


if __name__ == "__main__":
    act_dim, pop_dim, batch = 4, 16, 8
    decode = "fr-mlp"

    key = jax.random.PRNGKey(0)
    k_x, k_w, k_b = jax.random.split(key, 3)

    # Parameter init matching nn.Conv1d(act_dim, act_dim, pop_dim, groups=act_dim):
    # weight (act_dim, 1, pop_dim), bias (act_dim,), uniform(+-1/sqrt(fan_in)).
    fan_in = pop_dim
    bound = 1.0 / (fan_in ** 0.5)
    weight = jax.random.uniform(k_w, (act_dim, 1, pop_dim), jnp.float32, -bound, bound)
    bias = jax.random.uniform(k_b, (act_dim,), jnp.float32, -bound, bound)
    pop_act = jax.random.normal(k_x, (batch, act_dim * pop_dim), jnp.float32)

    decoder = make_pop_decoder(weight, bias, act_dim=act_dim, pop_dim=pop_dim,
                               decode=decode)

    # force_pallas=True exercises the Pallas path even at this tiny demo size
    # (production small-N calls would take the XLA fast path automatically).
    out = jax.block_until_ready(decoder(pop_act, force_pallas=True))

    ref = _reference(pop_act, weight, bias,
                     act_dim=act_dim, pop_dim=pop_dim, decode=decode)
    assert out.shape == (batch, act_dim), out.shape
    assert jnp.allclose(out, ref, atol=1e-5, rtol=1e-5)
    print("KERNEL_OK")
</pallas_src>

<mosaic_0001>
module attributes {stable_mosaic.version = 11 : i64} {
  func.func @_popdecoder_kernel(%arg0: i32, %arg1: memref<8x128xf32, #tpu.memory_space<vmem>>, %arg2: memref<128x8xf32, #tpu.memory_space<vmem>>, %arg3: memref<1x8xf32, #tpu.memory_space<vmem>>, %arg4: memref<8x8xf32, #tpu.memory_space<vmem>>) attributes {dimension_semantics = [#tpu.dimension_semantics<parallel>], iteration_bounds = array<i64: 1>, scalar_prefetch = 0 : i64, scratch_operands = 0 : i64, tpu.core_type = #tpu.core_type<tc>, window_params = [{transform_indices = @transform_0, window_bounds = array<i64: 8, 128>}, {pipeline_mode = #tpu.pipeline_mode<synchronous>, transform_indices = @transform_1, window_bounds = array<i64: 128, 8>}, {pipeline_mode = #tpu.pipeline_mode<synchronous>, transform_indices = @transform_2, window_bounds = array<i64: 1, 8>}, {transform_indices = @transform_3, window_bounds = array<i64: 8, 8>}]} {
    %c0 = arith.constant 0 : index
    %c0_0 = arith.constant 0 : index
    %0 = vector.load %arg1[%c0, %c0_0] : memref<8x128xf32, #tpu.memory_space<vmem>>, vector<8x128xf32>
    %c0_1 = arith.constant 0 : index
    %c0_2 = arith.constant 0 : index
    %1 = vector.load %arg2[%c0_1, %c0_2] : memref<128x8xf32, #tpu.memory_space<vmem>>, vector<128x8xf32>
    %cst = arith.constant dense<0.000000e+00> : vector<8x8xf32>
    %2 = tpu.matmul %0, %1, %cst {dimension_numbers = #tpu.dot_dimension_numbers<[1], [0], [0], [1], [0, 0, 1, 1], [], []>} : vector<8x128xf32>, vector<128x8xf32>, vector<8x8xf32> -> vector<8x8xf32>
    %c0_3 = arith.constant 0 : index
    %c0_4 = arith.constant 0 : index
    %3 = vector.load %arg3[%c0_3, %c0_4] : memref<1x8xf32, #tpu.memory_space<vmem>>, vector<1x8xf32>
    %4 = vector.broadcast %3 : vector<1x8xf32> to vector<8x8xf32>
    %5 = arith.addf %2, %4 : vector<8x8xf32>
    %6 = math.tanh %5 : vector<8x8xf32>
    %c0_5 = arith.constant 0 : index
    %c0_6 = arith.constant 0 : index
    %7 = vector.load %arg4[%c0_5, %c0_6] : memref<8x8xf32, #tpu.memory_space<vmem>>, vector<8x8xf32>
    tpu.vector_store %arg4[%c0_5, %c0_6], %6 {strides = array<i32>} : memref<8x8xf32, #tpu.memory_space<vmem>>, vector<8x8xf32>,
    return
  }
  func.func @transform_0(%arg0: i32) -> (i32, i32) {
    %c0_i32 = arith.constant 0 : i32
    %c0_i32_0 = arith.constant 0 : i32
    return %arg0, %c0_i32 : i32, i32
  }
  func.func @transform_1(%arg0: i32) -> (i32, i32) {
    %c0_i32 = arith.constant 0 : i32
    %c0_i32_0 = arith.constant 0 : i32
    %c0_i32_1 = arith.constant 0 : i32
    return %c0_i32, %c0_i32_0 : i32, i32
  }
  func.func @transform_2(%arg0: i32) -> (i32, i32) {
    %c0_i32 = arith.constant 0 : i32
    %c0_i32_0 = arith.constant 0 : i32
    %c0_i32_1 = arith.constant 0 : i32
    return %c0_i32, %c0_i32_0 : i32, i32
  }
  func.func @transform_3(%arg0: i32) -> (i32, i32) {
    %c0_i32 = arith.constant 0 : i32
    %c0_i32_0 = arith.constant 0 : i32
    return %arg0, %c0_i32 : i32, i32
  }
}

</mosaic_0001>

<bundles_post_ra>
// kernel: tpu_custom_call.1
= control target key start
LH: loop header
LB: loop body
LE: loop exit
PB: predicated region body
PF: predicated region fallthrough
CT: control target
= control target key end

     0   :  { %8 = vsyncpa [#allocation3], 0  ;;  %v210_v1 = vmov 0.0   ;;  %vm211_vm0 = vmmov 0   ;;  %vm110_vm1 = vcmask 64512   ;;  %s292_s0 = inlined_call_operand.vmem [shape: f32[4,128], index: 0, kind: input, shape index: {}]   ;;  %s293_s1 = inlined_call_operand.vmem [shape: f32[128,8], index: 1, kind: input, shape index: {}]   ;;  %s294_s2 = inlined_call_operand.vmem [shape: f32[1,8], index: 2, kind: input, shape index: {}]   ;;  %s295_s3 = inlined_call_operand.hbm [shape: f32[4,8], index: 3, kind: output, shape index: {}]  }
   0x1   :  { %v31_v0 = vld [vmem:[%s293_s1 + $0x78] sm:$0xff]  ;;  %146 = vmatprep.subr.mxu0 %v210_v1  ;;  %v30_v2 = vld [vmem:[%s293_s1 + $0x70] sm:$0xff]  ;;  %178 = vmatprep.mubr.msk.f32.mxu0 %vm211_vm0, %v210_v1  ;;  %v29_v3 = vld [vmem:[%s293_s1 + $0x68] sm:$0xff] }
   0x2   :  { %147 = vmatpush3.msra.mxu0 %v31_v0  ;;  %v28_v4 = vld [vmem:[%s293_s1 + $0x60] sm:$0xff]  ;;  %v27_v5 = vld [vmem:[%s293_s1 + $0x58] sm:$0xff]  ;;  %v26_v6 = vld [vmem:[%s293_s1 + $0x50] sm:$0xff] }
   0x3   :  { %148 = vmatprep.subr.mxu0 %v210_v1  ;;  %v25_v7 = vld [vmem:[%s293_s1 + $0x48] sm:$0xff]  ;;  %v24_v8 = vld [vmem:[%s293_s1 + $0x40] sm:$0xff]  ;;  %v23_v9 = vld [vmem:[%s293_s1 + $0x38] sm:$0xff] }
   0x4   :  { %149 = vmatpush3.msra.mxu0 %v30_v2  ;;  %v22_v10 = vld [vmem:[%s293_s1 + $0x30] sm:$0xff]  ;;  %v21_v11 = vld [vmem:[%s293_s1 + $0x28] sm:$0xff]  ;;  %v20_v12 = vld [vmem:[%s293_s1 + $0x20] sm:$0xff] }
   0x5   :  { %150 = vmatprep.subr.mxu0 %v210_v1  ;;  %v19_v13 = vld [vmem:[%s293_s1 + $0x18] sm:$0xff]  ;;  %v18_v14 = vld [vmem:[%s293_s1 + $0x10] sm:$0xff]  ;;  %v17_v15 = vld [vmem:[%s293_s1 + $0x8] sm:$0xff] }
   0x6   :  { %151 = vmatpush3.msra.mxu0 %v29_v3  ;;  %v16_v16 = vld [vmem:[%s293_s1] sm:$0xff] }
   0x7   :  { %152 = vmatprep.subr.mxu0 %v210_v1  ;;  %v15_v17 = vld [vmem:[%s292_s0] sm:$0xff] }
   0x8   :  { %153 = vmatpush3.msra.mxu0 %v28_v4  ;;  %v128_v18 = vld [vmem:[%s294_s2] ss:$0 sm:$0xff] }
   0x9   :  { %154 = vmatprep.subr.mxu0 %v210_v1 }
   0xa   :  { %155 = vmatpush3.msra.mxu0 %v27_v5 }
   0xb   :  { %156 = vmatprep.subr.mxu0 %v210_v1 }
   0xc   :  { %157 = vmatpush3.msra.mxu0 %v26_v6 }
   0xd   :  { %158 = vmatprep.subr.mxu0 %v210_v1 }
   0xe   :  { %159 = vmatpush3.msra.mxu0 %v25_v7 }
   0xf   :  { %160 = vmatprep.subr.mxu0 %v210_v1 }
  0x10   :  { %161 = vmatpush3.msra.mxu0 %v24_v8 }
  0x11   :  { %162 = vmatprep.subr.mxu0 %v210_v1 }
  0x12   :  { %163 = vmatpush3.msra.mxu0 %v23_v9 }
  0x13   :  { %164 = vmatprep.subr.mxu0 %v210_v1 }
  0x14   :  { %165 = vmatpush3.msra.mxu0 %v22_v10 }
  0x15   :  { %166 = vmatprep.subr.mxu0 %v210_v1 }
  0x16   :  { %167 = vmatpush3.msra.mxu0 %v21_v11 }
  0x17   :  { %168 = vmatprep.subr.mxu0 %v210_v1 }
  0x18   :  { %169 = vmatpush3.msra.mxu0 %v20_v12 }
  0x19   :  { %170 = vmatprep.subr.mxu0 %v210_v1 }
  0x1a   :  { %171 = vmatpush3.msra.mxu0 %v19_v13 }
  0x1b   :  { %172 = vmatprep.subr.mxu0 %v210_v1 }
  0x1c   :  { %173 = vmatpush3.msra.mxu0 %v18_v14 }
  0x1d   :  { %174 = vmatprep.subr.mxu0 %v210_v1 }
  0x1e   :  { %175 = vmatpush3.msra.mxu0 %v17_v15 }
  0x1f   :  { %176 = vmatprep.subr.mxu0 %v210_v1 }
  0x20   :  { %177 = vmatpush3.msra.mxu0 %v16_v16 }
  0x21   :  { %179 = vmatmul.mubr.f32.vlgmr.msra.gmra.mxu0 %v15_v17 }
  0xe1   :  { %v105_v19 = vpop.f32.mrf.mxu0 }
  0xe2   :  { %v106_v20 = vadd.f32 %v128_v18, %v105_v19 }
  0xe3   :  { %v180_v21 = vpop.f32.mrf.mxu0 }
  0xe4   :  { %186 = vtanh.f32 %v106_v20 }
  0xf1   :  { %v187_v22 = vpop.eup %186 }
  0xf2   :  { %111 = vst.msk [vmem:[#allocation2] sm:$0xff] %vm110_vm1, %v187_v22 }
  0xf3   :  { %116 = vsyncadd [#allocation3], 64  ;;  %s212_s1 = smov [#allocation2]  }
  0xf4   :  { %s117_s21 = sshll.u32 %s212_s1, 4  ;;  %s118_s21 = int_to_ptr.vmem [resolvable:$true] %s117_s21 }
  0xf5   :  { %s188_s22 = scalar_lea.vmem %s118_s21, 64  ;;  %s192_s0 = scalar_lea.vmem %s118_s21, 128 }
  0xf6   :  { %p189_p0 = scmp.ne.s32.totalorder %s118_s21, %s188_s22  ;;  %p193_p1 = scmp.lt.s32.totalorder %s118_s21, %s118_s21 }
  0xf7   :  { %p194_p2 = scmp.lt.s32.totalorder %s192_s0, %s188_s22 }
  0xf9   :  { %p195_p3 = por %p194_p2, %p193_p1 }
  0xfb   :  { %p196_p4 = pnand %p195_p3, %p189_p0 }
  0xfd   :  { %199 = shalt.err (!%p196_p4)
}
  0xfe   :  { %s213_s2 = smov 64   ;;  %s214_s23 = smov 4  }
  0xff   :  { %123 = dma.vmem_to_hbm [thread:$0]  %s118_s21, 64, %s295_s3, [#allocation3], %s213_s2, %s213_s2, %s214_s23  }
 0x100   :  { %208 = dma.done.wait [#allocation3], 128  }
 0x101   :  { %209 = vsyncadd [#allocation3], 4294967168 }
 0x102   :  { %127 = vsyncpa [#allocation3], 1 }

</bundles_post_ra>
